<compile_context>
chip_gen: v6e
topology: v6e:2x2x1
jax: 0.10.0
libtpu: 0.0.40
codegen_flags: <defaults>
</compile_context>

<pallas_src>
import functools

import jax
import jax.numpy as jnp
from jax.experimental import pallas as pl
from jax.experimental.pallas import tpu as pltpu


# ---------------------------------------------------------------------------
# In-kernel helper: 3x3 SAME conv (no bias) + folded BN + ReLU on a
# padded-flat bf16 slab, computed transposed so the lane axis is H*W.
# One K = 9*Cin MXU matmul per conv.
# ---------------------------------------------------------------------------
def _conv3x3_bn_relu(xp, w, scale, bias, mask_l, mask_r, *, H, W, L):
    """xp:   (Cin, P)      bf16; real pixel (h, w) at flat index L + h*W + w,
                            every padding entry is zero.
    w:     (Cout, 9*Cin)  bf16; column index = (dy*3 + dx)*Cin + cin.
    scale/bias: (Cout, 1) f32 folded BatchNorm.
    mask_l/mask_r: (1, HW) bool W-wraparound masks (hoisted by the caller).
    Returns (Cout, H*W) f32.
    """
    HW = H * W
    taps = []
    for dy in range(3):
        for dx in range(3):
            start = L + (dy - 1) * W + (dx - 1)
            t = xp[:, start:start + HW]                # bf16, static slice
            # Mask W-wraparound columns; H overflow already lands in zero pad.
            if dx == 0:
                t = jnp.where(mask_l, t, jnp.zeros_like(t))
            elif dx == 2:
                t = jnp.where(mask_r, t, jnp.zeros_like(t))
            taps.append(t)
    x_col = jnp.concatenate(taps, axis=0)              # (9*Cin, HW) bf16
    acc = jnp.dot(w, x_col, preferred_element_type=jnp.float32)
    return jnp.maximum(acc * scale + bias, 0.0)        # f32 epilogue


# ---------------------------------------------------------------------------
# Fused kernel: bilinear-2x upsample + channel concat + (conv3x3+BN+ReLU) x 2.
# ---------------------------------------------------------------------------
def _fused_up_kernel(x2_ref, x1_ref, u_ref, w1_ref, s1_ref, b1_ref,
                     w2_ref, s2_ref, b2_ref, o_ref, xp_ref, y1_ref,
                     *, H, W, L, C2):
    # x2_ref: (1, C2, HW)       bf16  skip connection (unpadded flat)
    # x1_ref: (1, C1, Hs*Ws)    bf16  low-res feature (to be upsampled 2x)
    # u_ref:  (Hs*Ws, HW)       bf16  bilinear-2x interpolation matrix
    # w1_ref: (Cout, 9*(C2+C1)) bf16  conv1 weights, [cout, (dy*3+dx)*Cin+cin]
    # w2_ref: (Cout, 9*Cout)    bf16  conv2 weights
    # s*/b*:  (Cout, 1)         f32   folded BN scale / bias
    # o_ref:  (1, Cout, HW)     f32   output
    # xp_ref: (C2+C1, P)        bf16  VMEM scratch: padded-flat concat input
    # y1_ref: (Cout, P)         bf16  VMEM scratch: padded-flat conv1 output
    HW = H * W
    P = xp_ref.shape[1]
    cin = xp_ref.shape[0]
    cout = y1_ref.shape[0]

    # Clear only the (lane-aligned) pad columns of the scratch slabs; the real
    # pixel region is fully overwritten below.
    xp_ref[:, :L] = jnp.zeros((cin, L), xp_ref.dtype)
    xp_ref[:, L + HW:] = jnp.zeros((cin, P - L - HW), xp_ref.dtype)
    y1_ref[:, :L] = jnp.zeros((cout, L), y1_ref.dtype)
    y1_ref[:, L + HW:] = jnp.zeros((cout, P - L - HW), y1_ref.dtype)

    # torch.cat([x2, upsample(x1)], dim=1), staged into the padded-flat slab.
    xp_ref[:C2, L:L + HW] = x2_ref[0]
    # Fused bilinear 2x upsample (align_corners=False): one MXU matmul with a
    # constant (bf16-exact) interpolation matrix.
    x1_up = jnp.dot(x1_ref[0], u_ref[...], preferred_element_type=jnp.float32)
    xp_ref[C2:, L:L + HW] = x1_up.astype(xp_ref.dtype)

    # Hoisted W-wraparound masks, shared by both convs.
    col = jax.lax.broadcasted_iota(jnp.int32, (1, HW), 1) % W
    mask_l = col >= 1
    mask_r = col < (W - 1)

    # conv1 + BN + ReLU -> stays in VMEM (padded-flat, bf16).
    y1 = _conv3x3_bn_relu(xp_ref[...], w1_ref[...], s1_ref[...], b1_ref[...],
                          mask_l, mask_r, H=H, W=W, L=L)
    y1_ref[:, L:L + HW] = y1.astype(y1_ref.dtype)

    # conv2 + BN + ReLU -> dense (Cout, HW) f32 store.
    y2 = _conv3x3_bn_relu(y1_ref[...], w2_ref[...], s2_ref[...], b2_ref[...],
                          mask_l, mask_r, H=H, W=W, L=L)
    o_ref[...] = y2[None, :, :].astype(o_ref.dtype)


# ---------------------------------------------------------------------------
# Wrapper-side constants / parameter packing.
# ---------------------------------------------------------------------------
def _upsample_matrix_1d(n_in):
    """(2*n_in, n_in) matrix M with out = M @ in matching PyTorch
    F.interpolate(scale_factor=2, mode='bilinear', align_corners=False)."""
    n_out = 2 * n_in
    i = jnp.arange(n_out, dtype=jnp.float32)
    src = jnp.maximum((i + 0.5) * (n_in / n_out) - 0.5, 0.0)
    i0 = jnp.floor(src).astype(jnp.int32)
    frac = src - i0.astype(jnp.float32)
    i1 = jnp.minimum(i0 + 1, n_in - 1)
    return (jax.nn.one_hot(i0, n_in, dtype=jnp.float32) * (1.0 - frac)[:, None]
            + jax.nn.one_hot(i1, n_in, dtype=jnp.float32) * frac[:, None])


def _pack_conv_weight(w_oihw):
    """PyTorch OIHW (cout, cin, 3, 3) -> (cout, 9*cin) bf16 with column index
    (dy*3 + dx)*cin + cin (matches the kernel's X_col row order)."""
    cout, cin = w_oihw.shape[0], w_oihw.shape[1]
    w9 = jnp.transpose(w_oihw, (0, 2, 3, 1))        # (cout, dy, dx, cin)
    return w9.reshape(cout, 9 * cin).astype(jnp.bfloat16)


# ---------------------------------------------------------------------------
# Up.forward
# ---------------------------------------------------------------------------
def up_forward(params, x1_nchw, x2_nchw):
    """Up.forward: bilinear 2x upsample(x1); cat([x2, x1], dim=1);
    (conv3x3 no-bias + BN + ReLU) x 2.  NCHW in, NCHW out."""
    N, C1, Hs, Ws = x1_nchw.shape
    _, C2, H, W = x2_nchw.shape
    assert H == 2 * Hs and W == 2 * Ws
    HW = H * W
    c_out = params["w1"].shape[0]
    c_in = C1 + C2

    # Padded-flat layout: real pixel (h, w) at flat index L + h*W + w.
    # L is 128-aligned and >= W+1; total width P is 128-aligned and leaves a
    # right pad >= W+1 so every 3x3 tap slice stays in-bounds.
    L = ((W + 1 + 127) // 128) * 128
    P = ((L + HW + W + 1 + 127) // 128) * 128

    # Kernel-layout parameters (bf16 weights, f32 folded-BN epilogue).
    w1 = _pack_conv_weight(params["w1"])             # (c_out, 9*c_in)
    w2 = _pack_conv_weight(params["w2"])             # (c_out, 9*c_out)
    s1 = params["s1"].reshape(c_out, 1)
    b1 = params["b1"].reshape(c_out, 1)
    s2 = params["s2"].reshape(c_out, 1)
    b2 = params["b2"].reshape(c_out, 1)

    # Constant bilinear-2x interpolation matrix (exact in bf16), unpadded.
    mh = _upsample_matrix_1d(Hs)                     # (H, Hs)
    mw = _upsample_matrix_1d(Ws)                     # (W, Ws)
    u = jnp.einsum("hi,wj->ijhw", mh, mw).reshape(Hs * Ws, HW)
    u = u.astype(jnp.bfloat16)

    # NCHW -> channels-first flat is a pure reshape (no transpose, no pad).
    x1_flat = x1_nchw.reshape(N, C1, Hs * Ws).astype(jnp.bfloat16)
    x2_flat = x2_nchw.reshape(N, C2, HW).astype(jnp.bfloat16)

    kernel = functools.partial(_fused_up_kernel, H=H, W=W, L=L, C2=C2)

    out = pl.pallas_call(
        kernel,
        out_shape=jax.ShapeDtypeStruct((N, c_out, HW), jnp.float32),
        grid_spec=pltpu.PrefetchScalarGridSpec(
            num_scalar_prefetch=0,
            grid=(N,),
            in_specs=[
                pl.BlockSpec((1, C2, HW), lambda n: (n, 0, 0)),
                pl.BlockSpec((1, C1, Hs * Ws), lambda n: (n, 0, 0)),
                pl.BlockSpec((Hs * Ws, HW), lambda n: (0, 0)),
                pl.BlockSpec((c_out, 9 * c_in), lambda n: (0, 0)),
                pl.BlockSpec((c_out, 1), lambda n: (0, 0)),
                pl.BlockSpec((c_out, 1), lambda n: (0, 0)),
                pl.BlockSpec((c_out, 9 * c_out), lambda n: (0, 0)),
                pl.BlockSpec((c_out, 1), lambda n: (0, 0)),
                pl.BlockSpec((c_out, 1), lambda n: (0, 0)),
            ],
            out_specs=pl.BlockSpec((1, c_out, HW), lambda n: (n, 0, 0)),
            scratch_shapes=[
                pltpu.VMEM((c_in, P), jnp.bfloat16),   # padded-flat concat in
                pltpu.VMEM((c_out, P), jnp.bfloat16),  # padded-flat conv1 out
            ],
        ),
        compiler_params=pltpu.CompilerParams(
            dimension_semantics=("parallel",),
            vmem_limit_bytes=32 * 1024 * 1024,
        ),
    )(x2_flat, x1_flat, u, w1, s1, b1, w2, s2, b2)

    return out.reshape(N, c_out, H, W)


# ---------------------------------------------------------------------------
# Deterministic synthetic parameters.
# ---------------------------------------------------------------------------
def _fold_bn(key, c, eps=1e-5):
    k1, k2, k3, k4 = jax.random.split(key, 4)
    gamma = 1.0 + 0.1 * jax.random.normal(k1, (c,), jnp.float32)
    beta = 0.1 * jax.random.normal(k2, (c,), jnp.float32)
    mean = 0.1 * jax.random.normal(k3, (c,), jnp.float32)
    var = 0.5 + jax.random.uniform(k4, (c,), jnp.float32)
    scale = gamma / jnp.sqrt(var + eps)
    shift = beta - mean * scale
    return scale, shift


def init_up_params(key, c_in, c_out):
    kw1, kb1, kw2, kb2 = jax.random.split(key, 4)
    s1, b1 = _fold_bn(kb1, c_out)
    s2, b2 = _fold_bn(kb2, c_out)
    return dict(
        w1=0.1 * jax.random.normal(kw1, (c_out, c_in, 3, 3), jnp.float32),
        s1=s1, b1=b1,
        w2=0.1 * jax.random.normal(kw2, (c_out, c_out, 3, 3), jnp.float32),
        s2=s2, b2=b2,
    )


# ---------------------------------------------------------------------------
# Pure-JAX references for correctness checking.
# ---------------------------------------------------------------------------
def _upsample2x_bilinear_nchw(x):
    N, C, H, W = x.shape

    def coords(n_in):
        i = jnp.arange(2 * n_in, dtype=jnp.float32)
        src = jnp.maximum((i + 0.5) * 0.5 - 0.5, 0.0)
        i0 = jnp.floor(src).astype(jnp.int32)
        frac = src - i0.astype(jnp.float32)
        i1 = jnp.minimum(i0 + 1, n_in - 1)
        return i0, i1, frac

    h0, h1, fh = coords(H)
    w0, w1, fw = coords(W)
    top = (x[:, :, h0, :] * (1.0 - fh)[None, None, :, None]
           + x[:, :, h1, :] * fh[None, None, :, None])
    return (top[:, :, :, w0] * (1.0 - fw)[None, None, None, :]
            + top[:, :, :, w1] * fw[None, None, None, :])


def up_forward_ref(params, x1_nchw, x2_nchw, match_bf16=True):
    """match_bf16=True mirrors the kernel's bf16-operand / f32-accumulation
    casts (tight comparison); False is plain f32 PyTorch semantics."""
    cast = ((lambda v: v.astype(jnp.bfloat16).astype(jnp.float32))
            if match_bf16 else (lambda v: v))

    x1u = _upsample2x_bilinear_nchw(cast(x1_nchw))
    x = jnp.concatenate([cast(x2_nchw), cast(x1u)], axis=1)

    def block(xin, w_oihw, scale, bias):
        if match_bf16:
            xin = xin.astype(jnp.bfloat16)
            w_oihw = w_oihw.astype(jnp.bfloat16)
        y = jax.lax.conv_general_dilated(
            xin, w_oihw, window_strides=(1, 1), padding="SAME",
            dimension_numbers=("NCHW", "OIHW", "NCHW"),
            preferred_element_type=jnp.float32)
        y = y * scale[None, :, None, None] + bias[None, :, None, None]
        return jnp.maximum(y, 0.0)

    y = block(x, params["w1"], params["s1"], params["b1"])
    y = block(cast(y), params["w2"], params["s2"], params["b2"])
    return y


if __name__ == "__main__":
    key = jax.random.PRNGKey(0)
    k_p, k1, k2 = jax.random.split(key, 3)

    # Up(c_in=16, c_out=8): x1 is the low-res feature (N, 8, 8, 8) NCHW,
    # x2 is the skip connection (N, 8, 16, 16) NCHW; concat -> 16 channels.
    N, C1, Hs, Ws = 2, 8, 8, 8
    C2, H, W = 8, 16, 16
    c_in, c_out = C2 + C1, 8

    x1 = jax.random.normal(k1, (N, C1, Hs, Ws), jnp.float32)
    x2 = jax.random.normal(k2, (N, C2, H, W), jnp.float32)
    params = init_up_params(k_p, c_in, c_out)

    fwd = jax.jit(functools.partial(up_forward, params))
    out = fwd(x1, x2)
    jax.block_until_ready(out)
    assert out.shape == (N, c_out, H, W), out.shape

    # Tight check against a cast-matched (bf16 operand / f32 accum) reference,
    # plus a looser sanity check against plain-f32 PyTorch semantics.
    ref_m = up_forward_ref(params, x1, x2, match_bf16=True)
    ref_f = up_forward_ref(params, x1, x2, match_bf16=False)
    err_m = float(jnp.max(jnp.abs(out - ref_m)))
    err_f = float(jnp.max(jnp.abs(out - ref_f)))
    assert jnp.allclose(out, ref_m, atol=1e-2, rtol=1e-2), err_m
    assert jnp.allclose(out, ref_f, atol=1e-1, rtol=1e-1), err_f
    print("KERNEL_OK")
</pallas_src>

<mosaic_0001>
module attributes {stable_mosaic.version = 11 : i64} {
  func.func @_fused_up_kernel(%arg0: i32, %arg1: memref<1x8x256xbf16, #tpu.memory_space<vmem>>, %arg2: memref<1x8x64xbf16, #tpu.memory_space<vmem>>, %arg3: memref<64x256xbf16, #tpu.memory_space<vmem>>, %arg4: memref<8x144xbf16, #tpu.memory_space<vmem>>, %arg5: memref<8x1xf32, #tpu.memory_space<vmem>>, %arg6: memref<8x1xf32, #tpu.memory_space<vmem>>, %arg7: memref<8x72xbf16, #tpu.memory_space<vmem>>, %arg8: memref<8x1xf32, #tpu.memory_space<vmem>>, %arg9: memref<8x1xf32, #tpu.memory_space<vmem>>, %arg10: memref<1x8x256xf32, #tpu.memory_space<vmem>>, %arg11: memref<16x512xbf16, #tpu.memory_space<vmem>>, %arg12: memref<8x512xbf16, #tpu.memory_space<vmem>>) attributes {dimension_semantics = [#tpu.dimension_semantics<parallel>], iteration_bounds = array<i64: 2>, scalar_prefetch = 0 : i64, scratch_operands = 2 : i64, tpu.core_type = #tpu.core_type<tc>, window_params = [{transform_indices = @transform_0, window_bounds = array<i64: 1, 8, 256>}, {transform_indices = @transform_1, window_bounds = array<i64: 1, 8, 64>}, {pipeline_mode = #tpu.pipeline_mode<synchronous>, transform_indices = @transform_2, window_bounds = array<i64: 64, 256>}, {pipeline_mode = #tpu.pipeline_mode<synchronous>, transform_indices = @transform_3, window_bounds = array<i64: 8, 144>}, {pipeline_mode = #tpu.pipeline_mode<synchronous>, transform_indices = @transform_4, window_bounds = array<i64: 8, 1>}, {pipeline_mode = #tpu.pipeline_mode<synchronous>, transform_indices = @transform_5, window_bounds = array<i64: 8, 1>}, {pipeline_mode = #tpu.pipeline_mode<synchronous>, transform_indices = @transform_6, window_bounds = array<i64: 8, 72>}, {pipeline_mode = #tpu.pipeline_mode<synchronous>, transform_indices = @transform_7, window_bounds = array<i64: 8, 1>}, {pipeline_mode = #tpu.pipeline_mode<synchronous>, transform_indices = @transform_8, window_bounds = array<i64: 8, 1>}, {transform_indices = @transform_9, window_bounds = array<i64: 1, 8, 256>}]} {
    %cst = arith.constant 0.000000e+00 : bf16
    %0 = vector.broadcast %cst : bf16 to vector<16x128xbf16>
    %c0 = arith.constant 0 : index
    %c0_0 = arith.constant 0 : index
    %1 = vector.load %arg11[%c0, %c0_0] : memref<16x512xbf16, #tpu.memory_space<vmem>>, vector<16x128xbf16>
    tpu.vector_store %arg11[%c0, %c0_0], %0 {strides = array<i32>} : memref<16x512xbf16, #tpu.memory_space<vmem>>, vector<16x128xbf16>,
    %cst_1 = arith.constant 0.000000e+00 : bf16
    %2 = vector.broadcast %cst_1 : bf16 to vector<16x128xbf16>
    %c0_2 = arith.constant 0 : index
    %c384 = arith.constant 384 : index
    %3 = vector.load %arg11[%c0_2, %c384] : memref<16x512xbf16, #tpu.memory_space<vmem>>, vector<16x128xbf16>
    tpu.vector_store %arg11[%c0_2, %c384], %2 {strides = array<i32>} : memref<16x512xbf16, #tpu.memory_space<vmem>>, vector<16x128xbf16>,
    %cst_3 = arith.constant 0.000000e+00 : bf16
    %4 = vector.broadcast %cst_3 : bf16 to vector<8x128xbf16>
    %c0_4 = arith.constant 0 : index
    %c0_5 = arith.constant 0 : index
    %5 = vector.load %arg12[%c0_4, %c0_5] : memref<8x512xbf16, #tpu.memory_space<vmem>>, vector<8x128xbf16>
    tpu.vector_store %arg12[%c0_4, %c0_5], %4 {strides = array<i32>} : memref<8x512xbf16, #tpu.memory_space<vmem>>, vector<8x128xbf16>,
    %cst_6 = arith.constant 0.000000e+00 : bf16
    %6 = vector.broadcast %cst_6 : bf16 to vector<8x128xbf16>
    %c0_7 = arith.constant 0 : index
    %c384_8 = arith.constant 384 : index
    %7 = vector.load %arg12[%c0_7, %c384_8] : memref<8x512xbf16, #tpu.memory_space<vmem>>, vector<8x128xbf16>
    tpu.vector_store %arg12[%c0_7, %c384_8], %6 {strides = array<i32>} : memref<8x512xbf16, #tpu.memory_space<vmem>>, vector<8x128xbf16>,
    %c0_9 = arith.constant 0 : index
    %c0_10 = arith.constant 0 : index
    %c0_11 = arith.constant 0 : index
    %8 = vector.load %arg1[%c0_9, %c0_10, %c0_11] : memref<1x8x256xbf16, #tpu.memory_space<vmem>>, vector<1x8x256xbf16>
    %9 = vector.shape_cast %8 : vector<1x8x256xbf16> to vector<8x256xbf16>
    %c0_12 = arith.constant 0 : index
    %c128 = arith.constant 128 : index
    %10 = vector.load %arg11[%c0_12, %c128] : memref<16x512xbf16, #tpu.memory_space<vmem>>, vector<8x256xbf16>
    tpu.vector_store %arg11[%c0_12, %c128], %9 {strides = array<i32>} : memref<16x512xbf16, #tpu.memory_space<vmem>>, vector<8x256xbf16>,
    %c0_13 = arith.constant 0 : index
    %c0_14 = arith.constant 0 : index
    %c0_15 = arith.constant 0 : index
    %11 = vector.load %arg2[%c0_13, %c0_14, %c0_15] : memref<1x8x64xbf16, #tpu.memory_space<vmem>>, vector<1x8x64xbf16>
    %12 = vector.shape_cast %11 : vector<1x8x64xbf16> to vector<8x64xbf16>
    %c0_16 = arith.constant 0 : index
    %c0_17 = arith.constant 0 : index
    %13 = vector.load %arg3[%c0_16, %c0_17] : memref<64x256xbf16, #tpu.memory_space<vmem>>, vector<64x256xbf16>
    %cst_18 = arith.constant dense<0.000000e+00> : vector<8x256xf32>
    %14 = tpu.matmul %12, %13, %cst_18 {dimension_numbers = #tpu.dot_dimension_numbers<[1], [0], [0], [1], [0, 0, 1, 1], [], []>} : vector<8x64xbf16>, vector<64x256xbf16>, vector<8x256xf32> -> vector<8x256xf32>
    %15 = arith.truncf %14 : vector<8x256xf32> to vector<8x256xbf16>
    %c8 = arith.constant 8 : index
    %c128_19 = arith.constant 128 : index
    %16 = vector.load %arg11[%c8, %c128_19] : memref<16x512xbf16, #tpu.memory_space<vmem>>, vector<8x256xbf16>
    tpu.vector_store %arg11[%c8, %c128_19], %15 {strides = array<i32>} : memref<16x512xbf16, #tpu.memory_space<vmem>>, vector<8x256xbf16>,
    %17 = tpu.iota {dimensions = array<i32: 1>} : vector<1x256xi32>
    %c16_i32 = arith.constant 16 : i32
    %c0_i32 = arith.constant 0 : i32
    %18 = arith.cmpi eq, %c16_i32, %c0_i32 : i32
    %c1_i32 = arith.constant 1 : i32
    %19 = arith.select %18, %c1_i32, %c16_i32 : i32
    %20 = vector.broadcast %19 : i32 to vector<1x256xi32>
    %21 = arith.remsi %17, %20 : vector<1x256xi32>
    %c0_i32_20 = arith.constant 0 : i32
    %22 = vector.broadcast %c0_i32_20 : i32 to vector<1x256xi32>
    %23 = arith.cmpi ne, %21, %22 : vector<1x256xi32>
    %c0_i32_21 = arith.constant 0 : i32
    %24 = vector.broadcast %c0_i32_21 : i32 to vector<1x256xi32>
    %25 = arith.cmpi slt, %21, %24 : vector<1x256xi32>
    %c0_i32_22 = arith.constant 0 : i32
    %26 = arith.cmpi slt, %19, %c0_i32_22 : i32
    %27 = vector.broadcast %26 : i1 to vector<1x256xi1>
    %28 = vector.broadcast %27 : vector<1x256xi1> to vector<1x256xi1>
    %29 = arith.xori %25, %28 : vector<1x256xi1>
    %30 = arith.andi %29, %23 : vector<1x256xi1>
    %31 = vector.broadcast %19 : i32 to vector<1x256xi32>
    %32 = arith.addi %21, %31 : vector<1x256xi32>
    %33 = arith.select %30, %32, %21 : vector<1x256xi1>, vector<1x256xi32>
    %c1_i32_23 = arith.constant 1 : i32
    %34 = vector.broadcast %c1_i32_23 : i32 to vector<1x256xi32>
    %35 = arith.cmpi sge, %33, %34 : vector<1x256xi32>
    %c15_i32 = arith.constant 15 : i32
    %36 = vector.broadcast %c15_i32 : i32 to vector<1x256xi32>
    %37 = arith.cmpi slt, %33, %36 : vector<1x256xi32>
    %c0_24 = arith.constant 0 : index
    %c0_25 = arith.constant 0 : index
    %38 = vector.load %arg11[%c0_24, %c0_25] : memref<16x512xbf16, #tpu.memory_space<vmem>>, vector<16x512xbf16>
    %c0_26 = arith.constant 0 : index
    %c0_27 = arith.constant 0 : index
    %39 = vector.load %arg4[%c0_26, %c0_27] : memref<8x144xbf16, #tpu.memory_space<vmem>>, vector<8x144xbf16>
    %c0_28 = arith.constant 0 : index
    %c0_29 = arith.constant 0 : index
    %40 = vector.load %arg5[%c0_28, %c0_29] : memref<8x1xf32, #tpu.memory_space<vmem>>, vector<8x1xf32>
    %c0_30 = arith.constant 0 : index
    %c0_31 = arith.constant 0 : index
    %41 = vector.load %arg6[%c0_30, %c0_31] : memref<8x1xf32, #tpu.memory_space<vmem>>, vector<8x1xf32>
    %42 = vector.extract_strided_slice %38 {offsets = [0, 111], sizes = [16, 256], strides = [1, 1]} : vector<16x512xbf16> to vector<16x256xbf16>
    %cst_32 = arith.constant 0.000000e+00 : bf16
    %43 = vector.broadcast %cst_32 : bf16 to vector<16x256xbf16>
    %44 = vector.shape_cast %35 : vector<1x256xi1> to vector<1x256xi1>
    %45 = vector.broadcast %44 : vector<1x256xi1> to vector<16x256xi1>
    %46 = arith.select %45, %42, %43 : vector<16x256xi1>, vector<16x256xbf16>
    %47 = vector.extract_strided_slice %38 {offsets = [0, 112], sizes = [16, 256], strides = [1, 1]} : vector<16x512xbf16> to vector<16x256xbf16>
    %48 = vector.extract_strided_slice %38 {offsets = [0, 113], sizes = [16, 256], strides = [1, 1]} : vector<16x512xbf16> to vector<16x256xbf16>
    %cst_33 = arith.constant 0.000000e+00 : bf16
    %49 = vector.broadcast %cst_33 : bf16 to vector<16x256xbf16>
    %50 = vector.shape_cast %37 : vector<1x256xi1> to vector<1x256xi1>
    %51 = vector.broadcast %50 : vector<1x256xi1> to vector<16x256xi1>
    %52 = arith.select %51, %48, %49 : vector<16x256xi1>, vector<16x256xbf16>
    %53 = vector.extract_strided_slice %38 {offsets = [0, 127], sizes = [16, 256], strides = [1, 1]} : vector<16x512xbf16> to vector<16x256xbf16>
    %cst_34 = arith.constant 0.000000e+00 : bf16
    %54 = vector.broadcast %cst_34 : bf16 to vector<16x256xbf16>
    %55 = vector.shape_cast %35 : vector<1x256xi1> to vector<1x256xi1>
    %56 = vector.broadcast %55 : vector<1x256xi1> to vector<16x256xi1>
    %57 = arith.select %56, %53, %54 : vector<16x256xi1>, vector<16x256xbf16>
    %58 = vector.extract_strided_slice %38 {offsets = [0, 128], sizes = [16, 256], strides = [1, 1]} : vector<16x512xbf16> to vector<16x256xbf16>
    %59 = vector.extract_strided_slice %38 {offsets = [0, 129], sizes = [16, 256], strides = [1, 1]} : vector<16x512xbf16> to vector<16x256xbf16>
    %cst_35 = arith.constant 0.000000e+00 : bf16
    %60 = vector.broadcast %cst_35 : bf16 to vector<16x256xbf16>
    %61 = vector.shape_cast %37 : vector<1x256xi1> to vector<1x256xi1>
    %62 = vector.broadcast %61 : vector<1x256xi1> to vector<16x256xi1>
    %63 = arith.select %62, %59, %60 : vector<16x256xi1>, vector<16x256xbf16>
    %64 = vector.extract_strided_slice %38 {offsets = [0, 143], sizes = [16, 256], strides = [1, 1]} : vector<16x512xbf16> to vector<16x256xbf16>
    %cst_36 = arith.constant 0.000000e+00 : bf16
    %65 = vector.broadcast %cst_36 : bf16 to vector<16x256xbf16>
    %66 = vector.shape_cast %35 : vector<1x256xi1> to vector<1x256xi1>
    %67 = vector.broadcast %66 : vector<1x256xi1> to vector<16x256xi1>
    %68 = arith.select %67, %64, %65 : vector<16x256xi1>, vector<16x256xbf16>
    %69 = vector.extract_strided_slice %38 {offsets = [0, 144], sizes = [16, 256], strides = [1, 1]} : vector<16x512xbf16> to vector<16x256xbf16>
    %70 = vector.extract_strided_slice %38 {offsets = [0, 145], sizes = [16, 256], strides = [1, 1]} : vector<16x512xbf16> to vector<16x256xbf16>
    %cst_37 = arith.constant 0.000000e+00 : bf16
    %71 = vector.broadcast %cst_37 : bf16 to vector<16x256xbf16>
    %72 = vector.shape_cast %37 : vector<1x256xi1> to vector<1x256xi1>
    %73 = vector.broadcast %72 : vector<1x256xi1> to vector<16x256xi1>
    %74 = arith.select %73, %70, %71 : vector<16x256xi1>, vector<16x256xbf16>
    %75 = tpu.concatenate %46, %47, %52, %57, %58, %63, %68, %69, %74 in 0 : vector<16x256xbf16>, vector<16x256xbf16>, vector<16x256xbf16>, vector<16x256xbf16>, vector<16x256xbf16>, vector<16x256xbf16>, vector<16x256xbf16>, vector<16x256xbf16>, vector<16x256xbf16> -> vector<144x256xbf16>
    %cst_38 = arith.constant dense<0.000000e+00> : vector<8x256xf32>
    %76 = tpu.matmul %39, %75, %cst_38 {dimension_numbers = #tpu.dot_dimension_numbers<[1], [0], [0], [1], [0, 0, 1, 1], [], []>} : vector<8x144xbf16>, vector<144x256xbf16>, vector<8x256xf32> -> vector<8x256xf32>
    %77 = vector.broadcast %40 : vector<8x1xf32> to vector<8x256xf32>
    %78 = arith.mulf %76, %77 : vector<8x256xf32>
    %79 = vector.broadcast %41 : vector<8x1xf32> to vector<8x256xf32>
    %80 = arith.addf %78, %79 : vector<8x256xf32>
    %cst_39 = arith.constant 0.000000e+00 : f32
    %81 = vector.broadcast %cst_39 : f32 to vector<8x256xf32>
    %82 = arith.maximumf %80, %81 : vector<8x256xf32>
    %83 = arith.truncf %82 : vector<8x256xf32> to vector<8x256xbf16>
    %c0_40 = arith.constant 0 : index
    %c128_41 = arith.constant 128 : index
    %84 = vector.load %arg12[%c0_40, %c128_41] : memref<8x512xbf16, #tpu.memory_space<vmem>>, vector<8x256xbf16>
    tpu.vector_store %arg12[%c0_40, %c128_41], %83 {strides = array<i32>} : memref<8x512xbf16, #tpu.memory_space<vmem>>, vector<8x256xbf16>,
    %c0_42 = arith.constant 0 : index
    %c0_43 = arith.constant 0 : index
    %85 = vector.load %arg12[%c0_42, %c0_43] : memref<8x512xbf16, #tpu.memory_space<vmem>>, vector<8x512xbf16>
    %c0_44 = arith.constant 0 : index
    %c0_45 = arith.constant 0 : index
    %86 = vector.load %arg7[%c0_44, %c0_45] : memref<8x72xbf16, #tpu.memory_space<vmem>>, vector<8x72xbf16>
    %c0_46 = arith.constant 0 : index
    %c0_47 = arith.constant 0 : index
    %87 = vector.load %arg8[%c0_46, %c0_47] : memref<8x1xf32, #tpu.memory_space<vmem>>, vector<8x1xf32>
    %c0_48 = arith.constant 0 : index
    %c0_49 = arith.constant 0 : index
    %88 = vector.load %arg9[%c0_48, %c0_49] : memref<8x1xf32, #tpu.memory_space<vmem>>, vector<8x1xf32>
    %89 = vector.extract_strided_slice %85 {offsets = [0, 111], sizes = [8, 256], strides = [1, 1]} : vector<8x512xbf16> to vector<8x256xbf16>
    %cst_50 = arith.constant 0.000000e+00 : bf16
    %90 = vector.broadcast %cst_50 : bf16 to vector<8x256xbf16>
    %91 = vector.shape_cast %35 : vector<1x256xi1> to vector<1x256xi1>
    %92 = vector.broadcast %91 : vector<1x256xi1> to vector<8x256xi1>
    %93 = arith.select %92, %89, %90 : vector<8x256xi1>, vector<8x256xbf16>
    %94 = vector.extract_strided_slice %85 {offsets = [0, 112], sizes = [8, 256], strides = [1, 1]} : vector<8x512xbf16> to vector<8x256xbf16>
    %95 = vector.extract_strided_slice %85 {offsets = [0, 113], sizes = [8, 256], strides = [1, 1]} : vector<8x512xbf16> to vector<8x256xbf16>
    %cst_51 = arith.constant 0.000000e+00 : bf16
    %96 = vector.broadcast %cst_51 : bf16 to vector<8x256xbf16>
    %97 = vector.shape_cast %37 : vector<1x256xi1> to vector<1x256xi1>
    %98 = vector.broadcast %97 : vector<1x256xi1> to vector<8x256xi1>
    %99 = arith.select %98, %95, %96 : vector<8x256xi1>, vector<8x256xbf16>
    %100 = vector.extract_strided_slice %85 {offsets = [0, 127], sizes = [8, 256], strides = [1, 1]} : vector<8x512xbf16> to vector<8x256xbf16>
    %cst_52 = arith.constant 0.000000e+00 : bf16
    %101 = vector.broadcast %cst_52 : bf16 to vector<8x256xbf16>
    %102 = vector.shape_cast %35 : vector<1x256xi1> to vector<1x256xi1>
    %103 = vector.broadcast %102 : vector<1x256xi1> to vector<8x256xi1>
    %104 = arith.select %103, %100, %101 : vector<8x256xi1>, vector<8x256xbf16>
    %105 = vector.extract_strided_slice %85 {offsets = [0, 128], sizes = [8, 256], strides = [1, 1]} : vector<8x512xbf16> to vector<8x256xbf16>
    %106 = vector.extract_strided_slice %85 {offsets = [0, 129], sizes = [8, 256], strides = [1, 1]} : vector<8x512xbf16> to vector<8x256xbf16>
    %cst_53 = arith.constant 0.000000e+00 : bf16
    %107 = vector.broadcast %cst_53 : bf16 to vector<8x256xbf16>
    %108 = vector.shape_cast %37 : vector<1x256xi1> to vector<1x256xi1>
    %109 = vector.broadcast %108 : vector<1x256xi1> to vector<8x256xi1>
    %110 = arith.select %109, %106, %107 : vector<8x256xi1>, vector<8x256xbf16>
    %111 = vector.extract_strided_slice %85 {offsets = [0, 143], sizes = [8, 256], strides = [1, 1]} : vector<8x512xbf16> to vector<8x256xbf16>
    %cst_54 = arith.constant 0.000000e+00 : bf16
    %112 = vector.broadcast %cst_54 : bf16 to vector<8x256xbf16>
    %113 = vector.shape_cast %35 : vector<1x256xi1> to vector<1x256xi1>
    %114 = vector.broadcast %113 : vector<1x256xi1> to vector<8x256xi1>
    %115 = arith.select %114, %111, %112 : vector<8x256xi1>, vector<8x256xbf16>
    %116 = vector.extract_strided_slice %85 {offsets = [0, 144], sizes = [8, 256], strides = [1, 1]} : vector<8x512xbf16> to vector<8x256xbf16>
    %117 = vector.extract_strided_slice %85 {offsets = [0, 145], sizes = [8, 256], strides = [1, 1]} : vector<8x512xbf16> to vector<8x256xbf16>
    %cst_55 = arith.constant 0.000000e+00 : bf16
    %118 = vector.broadcast %cst_55 : bf16 to vector<8x256xbf16>
    %119 = vector.shape_cast %37 : vector<1x256xi1> to vector<1x256xi1>
    %120 = vector.broadcast %119 : vector<1x256xi1> to vector<8x256xi1>
    %121 = arith.select %120, %117, %118 : vector<8x256xi1>, vector<8x256xbf16>
    %122 = tpu.concatenate %93, %94, %99, %104, %105, %110, %115, %116, %121 in 0 : vector<8x256xbf16>, vector<8x256xbf16>, vector<8x256xbf16>, vector<8x256xbf16>, vector<8x256xbf16>, vector<8x256xbf16>, vector<8x256xbf16>, vector<8x256xbf16>, vector<8x256xbf16> -> vector<72x256xbf16>
    %cst_56 = arith.constant dense<0.000000e+00> : vector<8x256xf32>
    %123 = tpu.matmul %86, %122, %cst_56 {dimension_numbers = #tpu.dot_dimension_numbers<[1], [0], [0], [1], [0, 0, 1, 1], [], []>} : vector<8x72xbf16>, vector<72x256xbf16>, vector<8x256xf32> -> vector<8x256xf32>
    %124 = vector.broadcast %87 : vector<8x1xf32> to vector<8x256xf32>
    %125 = arith.mulf %123, %124 : vector<8x256xf32>
    %126 = vector.broadcast %88 : vector<8x1xf32> to vector<8x256xf32>
    %127 = arith.addf %125, %126 : vector<8x256xf32>
    %cst_57 = arith.constant 0.000000e+00 : f32
    %128 = vector.broadcast %cst_57 : f32 to vector<8x256xf32>
    %129 = arith.maximumf %127, %128 : vector<8x256xf32>
    %130 = vector.shape_cast %129 : vector<8x256xf32> to vector<1x8x256xf32>
    %c0_58 = arith.constant 0 : index
    %c0_59 = arith.constant 0 : index
    %c0_60 = arith.constant 0 : index
    %131 = vector.load %arg10[%c0_58, %c0_59, %c0_60] : memref<1x8x256xf32, #tpu.memory_space<vmem>>, vector<1x8x256xf32>
    tpu.vector_store %arg10[%c0_58, %c0_59, %c0_60], %130 {strides = array<i32>} : memref<1x8x256xf32, #tpu.memory_space<vmem>>, vector<1x8x256xf32>,
    return
  }
  func.func @transform_0(%arg0: i32) -> (i32, i32, i32) {
    %c0_i32 = arith.constant 0 : i32
    %c0_i32_0 = arith.constant 0 : i32
    %c0_i32_1 = arith.constant 0 : i32
    return %arg0, %c0_i32, %c0_i32_0 : i32, i32, i32
  }
  func.func @transform_1(%arg0: i32) -> (i32, i32, i32) {
    %c0_i32 = arith.constant 0 : i32
    %c0_i32_0 = arith.constant 0 : i32
    %c0_i32_1 = arith.constant 0 : i32
    return %arg0, %c0_i32, %c0_i32_0 : i32, i32, i32
  }
  func.func @transform_2(%arg0: i32) -> (i32, i32) {
    %c0_i32 = arith.constant 0 : i32
    %c0_i32_0 = arith.constant 0 : i32
    %c0_i32_1 = arith.constant 0 : i32
    return %c0_i32, %c0_i32_0 : i32, i32
  }
  func.func @transform_3(%arg0: i32) -> (i32, i32) {
    %c0_i32 = arith.constant 0 : i32
    %c0_i32_0 = arith.constant 0 : i32
    %c0_i32_1 = arith.constant 0 : i32
    return %c0_i32, %c0_i32_0 : i32, i32
  }
  func.func @transform_4(%arg0: i32) -> (i32, i32) {
    %c0_i32 = arith.constant 0 : i32
    %c0_i32_0 = arith.constant 0 : i32
    %c0_i32_1 = arith.constant 0 : i32
    return %c0_i32, %c0_i32_0 : i32, i32
  }
  func.func @transform_5(%arg0: i32) -> (i32, i32) {
    %c0_i32 = arith.constant 0 : i32
    %c0_i32_0 = arith.constant 0 : i32
    %c0_i32_1 = arith.constant 0 : i32
    return %c0_i32, %c0_i32_0 : i32, i32
  }
  func.func @transform_6(%arg0: i32) -> (i32, i32) {
    %c0_i32 = arith.constant 0 : i32
    %c0_i32_0 = arith.constant 0 : i32
    %c0_i32_1 = arith.constant 0 : i32
    return %c0_i32, %c0_i32_0 : i32, i32
  }
  func.func @transform_7(%arg0: i32) -> (i32, i32) {
    %c0_i32 = arith.constant 0 : i32
    %c0_i32_0 = arith.constant 0 : i32
    %c0_i32_1 = arith.constant 0 : i32
    return %c0_i32, %c0_i32_0 : i32, i32
  }
  func.func @transform_8(%arg0: i32) -> (i32, i32) {
    %c0_i32 = arith.constant 0 : i32
    %c0_i32_0 = arith.constant 0 : i32
    %c0_i32_1 = arith.constant 0 : i32
    return %c0_i32, %c0_i32_0 : i32, i32
  }
  func.func @transform_9(%arg0: i32) -> (i32, i32, i32) {
    %c0_i32 = arith.constant 0 : i32
    %c0_i32_0 = arith.constant 0 : i32
    %c0_i32_1 = arith.constant 0 : i32
    return %arg0, %c0_i32, %c0_i32_0 : i32, i32, i32
  }
}

</mosaic_0001>

<bundles_post_ra>
// kernel: up_forward.1
= control target key start
LH: loop header
LB: loop body
LE: loop exit
PB: predicated region body
PF: predicated region fallthrough
CT: control target
= control target key end

     0   :  { %s1458_s30 = smov 0   ;;  %s1898_s0 = inlined_call_operand.vmem [shape: bf16[2,8,256], index: 0, kind: input, shape index: {}]   ;;  %s1899_s1 = inlined_call_operand.vmem [shape: bf16[2,8,64], index: 1, kind: input, shape index: {}]   ;;  %s1900_s2 = inlined_call_operand.vmem [shape: bf16[64,256], index: 2, kind: input, shape index: {}]   ;;  %s1901_s3 = inlined_call_operand.vmem [shape: bf16[8,144], index: 3, kind: input, shape index: {}]   ;;  %s1902_s4 = inlined_call_operand.vmem [shape: f32[8,1], index: 4, kind: input, shape index: {}]   ;;  %s1903_s5 = inlined_call_operand.vmem [shape: f32[8,1], index: 5, kind: input, shape index: {}]   ;;  %s1904_s6 = inlined_call_operand.vmem [shape: bf16[8,72], index: 6, kind: input, shape index: {}]   ;;  %s1905_s7 = inlined_call_operand.vmem [shape: f32[8,1], index: 7, kind: input, shape index: {}]   ;;  %s1906_s8 = inlined_call_operand.vmem [shape: f32[8,1], index: 8, kind: input, shape index: {}]   ;;  %s1907_s9 = inlined_call_operand.vmem [shape: f32[2,8,256], index: 9, kind: output, shape index: {}]  }
   0x1 LB: > { %s1284_s10 = sadd.s32 4294967295, %s1398_s30   ;;  %p1288_p0 = scmp.ge.s32.totalorder %s1398_s30, 1  ;;  %s1398_s30 = sphi %s1458_s30, %s19_s30  }
   0x2   : > { %p296_p1 = scmp.lt.s32.totalorder %s1398_s30, 3 }
   0x4   : > { %p297_p2 = pnand %p1288_p0, %p296_p1 }
   0x5   : > { %p336_p3 = scmp.lt.s32.totalorder (!%p297_p2), %s1284_s10, 1  ;;  %s1401_s16 = smov (!%p297_p2), 113  }
   0x6   : > { %300 = sbr.rel (%p297_p2) target bundleno = 1440 (0x5a0), region = 56  ;;  %s1402_s17 = smov (!%p297_p2), 127  }
   0x7   : > { %s1403_s18 = smov (!%p297_p2), 111   ;;  %s1404_s19 = smov (!%p297_p2), 95  }
   0x8   : > { %s1405_s20 = smov (!%p297_p2), 112   ;;  %s1407_s22 = smov (!%p297_p2), 17  }
   0xb   : > { %v1372_v0 = vld [vmem:[%s1900_s2 + $0x34] ss:$8 sps:$4 sm:$0xff]   ;;  %v1374_v1 = vld [vmem:[%s1900_s2 + $0x30] ss:$8 sps:$4 sm:$0xff]   ;;  %v1400_v2 = vmov 0   ;;  %s1921_s10 = smov (!%p336_p3, %s1284_s10), 1  ;;  %v464_v13 = vlaneseq }
   0xc   : > { %446 = vmatprep.mubr.bf16.mxu0 %v1400_v2  ;;  %353 = vst [vmem:[#allocation2] sm:$0xf] %v1400_v2  ;;  %354 = vst [vmem:[#allocation2 + $0x10] sm:$0xf] %v1400_v2  ;;  %1370 = vset.pattern.permute.xlu0 %v1400_v2  ;;  %v1375_v3 = vld [vmem:[%s1900_s2 + $0x24] ss:$8 sps:$4 sm:$0xff]  }
   0xd   : > { %355 = vst [vmem:[#allocation2 + $0xc] sm:$0xf] %v1400_v2  ;;  %356 = vst [vmem:[#allocation2 + $0x1c] sm:$0xf] %v1400_v2  ;;  %422 = vmatprep.subr.bf16.mxu0 %v1372_v0  ;;  %1371 = vset.pattern.permute.xlu1 %v1400_v2  ;;  %v1377_v4 = vld [vmem:[%s1900_s2 + $0x20] ss:$8 sps:$4 sm:$0xff]  }
   0xe   : > { %357 = vst [vmem:[#allocation3] sm:$0xf] %v1400_v2  ;;  %358 = vst [vmem:[#allocation3 + $0xc] sm:$0xf] %v1400_v2  ;;  %423 = vmatpush1.bf16.msra.mxu0 %v1374_v1  ;;  %v1378_v5 = vld [vmem:[%s1900_s2 + $0x14] ss:$8 sps:$4 sm:$0xff]  }
   0xf   : > { %424 = vmatprep.subr.bf16.mxu0 %v1375_v3  ;;  %s1350_s21 = sshll.u32 %s1921_s10, 3  ;;  %v1380_v7 = vld [vmem:[%s1900_s2 + $0x10] ss:$8 sps:$4 sm:$0xff]   ;;  %v1381_v8 = vld [vmem:[%s1900_s2 + $0x4] ss:$8 sps:$4 sm:$0xff]   ;;  %s1291_s29 = sshll.u32 %s1921_s10, 2 }
  0x10   : > { %s340_s24 = scalar_lea.vmem %s1898_s0, %s1350_s21  ;;  %v1383_v9 = vld [vmem:[%s1900_s2] ss:$8 sps:$4 sm:$0xff]   ;;  %s344_s15 = scalar_lea.vmem %s1899_s1, %s1291_s29  ;;  %vm410_vm0 = vcmask 523264   ;;  %v465_v14 = vand.u32 127, %v464_v13  ;;  %vm563_vm7 = vcmask 1043456   ;;  %vm528_vm8 = vcmask 924672  }
  0x11   : > { %v359_v6 = vld [vmem:[%s340_s24] sm:$0xff]  ;;  %vm539_vm9 = vcmask 1039360   ;;  %s1406_s21 = smov 126   ;;  %vm511_vm14 = vcmask 908288   ;;  %vm726_vm15 = vcmask 777216  }
  0x12   : > { %425 = vmatpush1.bf16.msra.mxu0 %v1377_v4  ;;  %360 = vst [vmem:[#allocation2 + $0x4] sm:$0xff] %v359_v6  ;;  %v361_v11 = vld [vmem:[%s344_s15] sm:$0xf]  ;;  %v466_v16 = vadd.s32 128, %v465_v14  ;;  %v471_v20 = vand.u32 15, %v465_v14 }
  0x13   : > { %426 = vmatprep.subr.bf16.mxu0 %v1378_v5 }
  0x14   : > { %v478_v21 = vand.u32 15, %v466_v16  ;;  %vm491_vm1 = vcmp.ge.s32.totalorder %v471_v20, 1  ;;  %vm493_vm4 = vcmp.lt.s32.totalorder %v471_v20, 15 }
  0x16   : > { %427 = vmatpush1.bf16.msra.mxu0 %v1380_v7  ;;  %vm492_vm2 = vcmp.ge.s32.totalorder %v478_v21, 1  ;;  %vm494_vm5 = vcmp.lt.s32.totalorder %v478_v21, 15 }
  0x17   : > { %428 = vmatprep.subr.bf16.mxu0 %v1381_v8  ;;  %vm1522_vm3 = vmpackc.low %vm492_vm2, %vm491_vm1  ;;  %vm661_vm1 = vcmask 1031168  }
  0x18   : > { %v1535_v25 = vsel %vm1522_vm3, 65537, %v1400_v2  ;;  %vm1543_vm6 = vmpackc.low %vm494_vm5, %vm493_vm4  ;;  %vm802_vm4 = vcmask 138240  }
  0x19   : > { %v1509_v10 = vld [vmem:[#allocation2] sm:$0xff]  ;;  %v1514_v12 = vld [vmem:[#allocation2 + $0x8] sm:$0xff]  ;;  %v524_v28 = vsel %vm1543_vm6, 65537, %v1400_v2 }
  0x1a   : > { %429 = vmatpush1.bf16.msra.mxu0 %v1383_v9  ;;  %572 = vrot.lane.b32.xlu0 %v1509_v10, %s1401_s16 }
  0x1b   : > { %553 = vrot.lane.b32.xlu1 %v1514_v12, %s1402_s17 }
  0x1d   : > { %1302 = vmatmul.mubr.msk.bf16.vlgmr.msra.gmra.mxu0 %vm410_vm0, %v361_v11  ;;  %vm683_vm0 = vcmask 916480  }
  0x1e   : > { %1190 = vmatprep.mubr.bf16.mxu0 %v1400_v2  ;;  %574 = vrot.lane.b32.xlu0 %v1514_v12, %s1401_s16 }
  0x22   : > { %551 = vrot.lane.b32.xlu0 %v1509_v10, %s1402_s17 }
  0x8c   : > { %v573_v32 = vpop.permute.xlu0 %572 }
  0x8d   : > { %v554_v34 = vpop.permute.xlu1 %553  ;;  %v580_v36 = vrot.slane %v573_v32, 4 }
  0x8e   : > { %v560_v41 = vrot.slane %v554_v34, 4 }
  0x90   : > { %v575_v33 = vpop.permute.xlu0 %574 }
  0x91   : > { %v581_v37 = vrot.slane %v575_v33, 4 }
  0x93   : > { %v584_v40 = vsel %vm563_vm7, %v580_v36, %v581_v37 }
  0x94   : > { %v552_v35 = vpop.permute.xlu0 %551  ;;  %v585_v45 = vsel %vm528_vm8, %v584_v40, %v575_v33 }
  0x95   : > { %v559_v42 = vrot.slane %v552_v35, 4  ;;  %v590_v52 = vsel %vm1522_vm3, %v585_v45, 0 }
  0x97   : > { %v564_v49 = vsel %vm563_vm7, %v559_v42, %v560_v41 }
  0x98   : > { %v565_v62 = vsel %vm539_vm9, %v564_v49, %v554_v34 }
  0x99   : > { %v570_v5 = vsel %vm1543_vm6, %v565_v62, 0 }
  0xdd   : > { %v448_v15 = vpop.f32.mrf.mxu0 }
  0xdf   : > { %v450_v17 = vpop.f32.mrf.mxu0 }
  0xe0   : > { %v1352_v18 = vpack.c.bf16 %v450_v17, %v448_v15 }
  0xe1   : > { %v452_v19 = vpop.f32.mrf.mxu0 }
  0xe2   : > { %463 = vst [vmem:[#allocation2 + $0x14] sm:$0xff] %v1352_v18 }
  0xe3   : > { %v453_v22 = vpop.f32.mrf.mxu0 }
  0xe9   : > { %v1526_v24 = vld [vmem:[#allocation2 + $0x10] sm:$0xff]  ;;  %v1537_v26 = vld [vmem:[#allocation2 + $0x18] sm:$0xff] }
  0xea   : > { %576 = vrot.lane.b32.xlu1 %v1526_v24, %s1401_s16  ;;  %555 = vrot.lane.b32.xlu0 %v1526_v24, %s1402_s17  ;;  %v1559_v29 = vcombine.high %v1509_v10, %v1526_v24  ;;  %v1320_v30 = vcombine.high %v1514_v12, %v1537_v26  ;;  %v1572_v31 = vcombine.low %v1514_v12, %v1537_v26 }
  0xee   : > { %578 = vrot.lane.b32.xlu1 %v1537_v26, %s1401_s16  ;;  %536 = vrot.lane.b32.xlu0 %v1535_v25, %s1402_s17 }
  0xf2   : > { %557 = vrot.lane.b32.xlu1 %v1537_v26, %s1402_s17  ;;  %592 = vrot.lane.b32.xlu0 %v1509_v10, %s1403_s18 }
  0xf6   : > { %525 = vrot.lane.b32.xlu1 %v524_v28, %s1401_s16  ;;  %596 = vrot.lane.b32.xlu0 %v1526_v24, %s1403_s18 }
  0xfa   : > { %594 = vrot.lane.b32.xlu1 %v1514_v12, %s1403_s18  ;;  %720 = vrot.lane.b32.xlu0 %v1559_v29, %s1404_s19 }
  0xfe   : > { %598 = vrot.lane.b32.xlu1 %v1537_v26, %s1403_s18  ;;  %724 = vrot.lane.b32.xlu0 %v1320_v30, %s1404_s19 }
 0x102   : > { %722 = vrot.lane.b32.xlu1 %v1572_v31, %s1404_s19  ;;  %688 = vrot.lane.b32.xlu0 %v1572_v31, %s1403_s18 }
 0x106   : > { %686 = vrot.lane.b32.xlu1 %v1559_v29, %s1403_s18 }
 0x15c   : > { %v577_v38 = vpop.permute.xlu1 %576  ;;  %v556_v39 = vpop.permute.xlu0 %555 }
 0x15d   : > { %v582_v46 = vrot.slane %v577_v38, 4  ;;  %v561_v53 = vrot.slane %v556_v39, 4 }
 0x160   : > { %v579_v43 = vpop.permute.xlu1 %578  ;;  %v537_v44 = vpop.permute.xlu0 %536 }
 0x161   : > { %v583_v47 = vrot.slane %v579_v43, 4  ;;  %v538_v48 = vrot.slane %v537_v44, 4 }
 0x163   : > { %v586_v50 = vsel %vm563_vm7, %v582_v46, %v583_v47  ;;  %v1585_v51 = vsel %vm539_vm9, %v538_v48, %v537_v44  ;;  %vm1601_vm11 = vcmp.ne.s16.totalorder %v538_v48, 0  ;;  %v1307_v44 = vcombine.low %v1509_v10, %v1526_v24 }
 0x164   : > { %v587_v54 = vsel %vm528_vm8, %v586_v50, %v579_v43  ;;  %vm541_vm10 = vcmp.ne.s16.totalorder %v1585_v51, 0  ;;  %v558_v55 = vpop.permute.xlu1 %557  ;;  %v544_v9 = vsel %vm1601_vm11, %v1514_v12, 0  ;;  %v546_v11 = vsel %vm1601_vm11, %v1537_v26, 0  ;;  %v593_v14 = vpop.permute.xlu0 %592 }
 0x165   : > { %v591_v56 = vsel %vm1522_vm3, %v587_v54, 0  ;;  %v543_v57 = vsel %vm541_vm10, %v1509_v10, 0  ;;  %v545_v58 = vsel %vm541_vm10, %v1526_v24, 0  ;;  %v562_v59 = vrot.slane %v558_v55, 4 }
 0x166   : > { %v1314_v60 = vcombine.high %v543_v57, %v545_v58  ;;  %v1319_v61 = vcombine.high %v590_v52, %v591_v56  ;;  %v1318_v6 = vcombine.low %v590_v52, %v591_v56  ;;  %v1315_v16 = vcombine.low %v544_v9, %v546_v11 }
 0x167   : > { %v566_v63 = vsel %vm563_vm7, %v561_v53, %v562_v59  ;;  %v1313_v21 = vcombine.low %v543_v57, %v545_v58  ;;  %v600_v33 = vrot.slane %v593_v14, 4 }
 0x168   : > { %v567_v1 = vsel %vm539_vm9, %v566_v63, %v558_v55  ;;  %v526_v2 = vpop.permute.xlu1 %525  ;;  %679 = vrot.lane.b32.xlu1 %v1314_v60, %s1405_s20  ;;  %714 = vrot.lane.b32.xlu0 %v1319_v61, %s1403_s18  ;;  %v597_v32 = vpop.permute.xlu0 %596 }
 0x169   : > { %v571_v3 = vsel %vm1543_vm6, %v567_v1, 0  ;;  %v527_v4 = vrot.slane %v526_v2, 4  ;;  %v602_v38 = vrot.slane %v597_v32, 4 }
 0x16a   : > { %v1317_v7 = vcombine.high %v570_v5, %v571_v3  ;;  %v1316_v15 = vcombine.low %v570_v5, %v571_v3 }
 0x16b   : > { %v1613_v8 = vsel %vm528_vm8, %v527_v4, %v526_v2  ;;  %vm1630_vm13 = vcmp.ne.s16.totalorder %v527_v4, 0 }
 0x16c   : > { %vm530_vm12 = vcmp.ne.s16.totalorder %v1613_v8, 0  ;;  %v595_v13 = vpop.permute.xlu1 %594  ;;  %712 = vrot.lane.b32.xlu1 %v1318_v6, %s1403_s18  ;;  %701 = vrot.lane.b32.xlu0 %v1317_v7, %s1403_s18  ;;  %v533_v28 = vsel %vm1630_vm13, %v1514_v12, 0  ;;  %v535_v30 = vsel %vm1630_vm13, %v1537_v26, 0  ;;  %v721_v43 = vpop.permute.xlu0 %720 }
 0x16d   : > { %v532_v17 = vsel %vm530_vm12, %v1509_v10, 0  ;;  %v534_v18 = vsel %vm530_vm12, %v1526_v24, 0  ;;  %v601_v34 = vrot.slane %v595_v13, 4  ;;  %v1312_v36 = vcombine.low %v533_v28, %v535_v30 }
 0x16e   : > { %v1311_v22 = vcombine.high %v532_v17, %v534_v18  ;;  %v1310_v37 = vcombine.low %v532_v17, %v534_v18 }
 0x16f   : > { %v604_v39 = vsel %vm563_vm7, %v600_v33, %v601_v34 }
 0x170   : > { %699 = vrot.lane.b32.xlu1 %v1316_v15, %s1403_s18  ;;  %681 = vrot.lane.b32.xlu0 %v1315_v16, %s1405_s20  ;;  %v599_v20 = vpop.permute.xlu1 %598  ;;  %v605_v41 = vsel %vm511_vm14, %v604_v39, %v595_v13  ;;  %v725_v49 = vpop.permute.xlu0 %724 }
 0x171   : > { %v603_v35 = vrot.slane %v599_v20, 4  ;;  %v610_v45 = vsel %vm1543_vm6, %v605_v41, 0  ;;  %v501_v41 = vld [vmem:[%s1903_s5] sm:$0xff] }
 0x173   : > { %v606_v40 = vsel %vm563_vm7, %v602_v38, %v603_v35  ;;  %v1724_v38 = vld [vmem:[%s1901_s3] sm:$0xff] }
 0x174   : > { %677 = vrot.lane.b32.xlu1 %v1313_v21, %s1405_s20  ;;  %657 = vrot.lane.b32.xlu0 %v1311_v22, %s1406_s21  ;;  %v607_v42 = vsel %vm511_vm14, %v606_v40, %v599_v20  ;;  %v723_v48 = vpop.permute.xlu1 %722  ;;  %v1324_v39 = vcombine.high %v1724_v38, %v1724_v38 }
 0x175   : > { %v611_v46 = vsel %vm1543_vm6, %v607_v42, 0  ;;  %v728_v50 = vsel %vm726_vm15, %v723_v48, %v725_v49 }
 0x176   : > { %v1321_v47 = vcombine.low %v610_v45, %v611_v46 }
 0x178   : > { %659 = vrot.lane.b32.xlu1 %v1312_v36, %s1406_s21  ;;  %655 = vrot.lane.b32.xlu0 %v1310_v37, %s1406_s21  ;;  %v687_v52 = vpop.permute.xlu1 %686 }
 0x17c   : > { %508 = vrot.lane.b32.xlu1 %v1535_v25, %s1403_s18  ;;  %636 = vrot.lane.b32.xlu0 %v1559_v29, %s1402_s17  ;;  %v1322_v25 = vcombine.high %v610_v45, %v611_v46  ;;  %v727_v29 = vsel %vm726_vm15, %v721_v43, %v723_v48 }
 0x180   : > { %638 = vrot.lane.b32.xlu1 %v1572_v31, %s1402_s17  ;;  %634 = vrot.lane.b32.xlu0 %v1307_v44, %s1402_s17  ;;  %v689_v31 = vpop.permute.xlu0 %688 }
 0x181   : > { %v690_v53 = vsel %vm511_vm14, %v687_v52, %v689_v31 }
 0x184   : > { %737 = vrot.lane.b32.xlu1 %v1321_v47, %s1403_s18  ;;  %739 = vrot.lane.b32.xlu0 %v1322_v25, %s1403_s18 }
 0x188   : > { %792 = vrot.lane.b32.xlu1 %v727_v29, %s1407_s22  ;;  %794 = vrot.lane.b32.xlu0 %v728_v50, %s1407_s22 }
 0x18c   : > { %790 = vrot.lane.b32.xlu1 %v721_v43, %s1407_s22  ;;  %774 = vrot.lane.b32.xlu0 %v690_v53, %s1407_s22 }
 0x190   : > { %776 = vrot.lane.b32.xlu1 %v689_v31, %s1407_s22  ;;  %772 = vrot.lane.b32.xlu0 %v687_v52, %s1407_s22 }
 0x1da   : > { %v680_v54 = vpop.permute.xlu1 %679  ;;  %v715_v55 = vpop.permute.xlu0 %714 }
 0x1de   : > { %v713_v56 = vpop.permute.xlu1 %712  ;;  %v702_v57 = vpop.permute.xlu0 %701 }
 0x1df   : > { %784 = vrot.lane.b32.xlu0 %v713_v56, %s1407_s22  ;;  %v716_v63 = vsel %vm511_vm14, %v713_v56, %v715_v55 }
 0x1e2   : > { %v700_v58 = vpop.permute.xlu1 %699  ;;  %v682_v59 = vpop.permute.xlu0 %681 }
 0x1e3   : > { %782 = vrot.lane.b32.xlu0 %v702_v57, %s1407_s22  ;;  %v685_v60 = vsel %vm683_vm0, %v680_v54, %v682_v59  ;;  %v703_v7 = vsel %vm511_vm14, %v700_v58, %v702_v57 }
 0x1e4   : > { %768 = vrot.lane.b32.xlu1 %v685_v60, %s1407_s22 }
 0x1e6   : > { %v678_v61 = vpop.permute.xlu1 %677  ;;  %v658_v62 = vpop.permute.xlu0 %657 }
 0x1e7   : > { %786 = vrot.lane.b32.xlu0 %v716_v63, %s1407_s22  ;;  %v684_v15 = vsel %vm683_vm0, %v678_v61, %v680_v54 }
 0x1e8   : > { %788 = vrot.lane.b32.xlu1 %v715_v55, %s1407_s22 }
 0x1ea   : > { %v660_v1 = vpop.permute.xlu1 %659  ;;  %v656_v2 = vpop.permute.xlu0 %655 }
 0x1eb   : > { %770 = vrot.lane.b32.xlu0 %v682_v59, %s1407_s22  ;;  %v663_v5 = vsel %vm661_vm1, %v658_v62, %v660_v1  ;;  %v662_v14 = vsel %vm661_vm1, %v656_v2, %v658_v62 }
 0x1ec   : > { %778 = vrot.lane.b32.xlu1 %v700_v58, %s1407_s22 }
 0x1ee   : > { %v509_v3 = vpop.permute.xlu1 %508  ;;  %v637_v4 = vpop.permute.xlu0 %636 }
 0x1ef   : > { %v510_v6 = vrot.slane %v509_v3, 4  ;;  %762 = vrot.lane.b32.xlu0 %v663_v5, %s1407_s22 }
 0x1f0   : > { %780 = vrot.lane.b32.xlu1 %v703_v7, %s1407_s22 }
 0x1f1   : > { %v1688_v9 = vsel %vm511_vm14, %v510_v6, %v509_v3  ;;  %vm1706_vm5 = vcmp.ne.s16.totalorder %v510_v6, 0 }
 0x1f2   : > { %v639_v11 = vpop.permute.xlu1 %638  ;;  %v635_v13 = vpop.permute.xlu0 %634  ;;  %vm1908_vm2 = vcmp.ne.s16.totalorder %v1688_v9, 0  ;;  %v516_v36 = vsel %vm1706_vm5, %v1514_v12, 0  ;;  %v518_v37 = vsel %vm1706_vm5, %v1537_v26, 0  ;;  %v500_v12 = vld [vmem:[%s1902_s4] sm:$0xff] }
 0x1f3   : > { %760 = vrot.lane.b32.xlu0 %v662_v14, %s1407_s22  ;;  %v515_v16 = vsel %vm1908_vm2, %v1509_v10, 0  ;;  %v517_v17 = vsel %vm1908_vm2, %v1526_v24, 0  ;;  %v641_v30 = vsel %vm539_vm9, %v637_v4, %v639_v11  ;;  %v640_v34 = vsel %vm539_vm9, %v635_v13, %v637_v4 }
 0x1f4   : > { %766 = vrot.lane.b32.xlu1 %v684_v15, %s1407_s22  ;;  %v1305_v21 = vcombine.high %v515_v16, %v517_v17  ;;  %v1304_v24 = vcombine.low %v515_v16, %v517_v17  ;;  %vm839_vm2 = vcmask 130048   ;;  %v1306_v40 = vcombine.low %v516_v36, %v518_v37 }
 0x1f5   : > { %1325 = vmatprep.mubr.msk.bf16.mxu1 %vm839_vm2, %v1324_v39 }
 0x1f6   : > { %v738_v18 = vpop.permute.xlu1 %737  ;;  %v740_v20 = vpop.permute.xlu0 %739 }
 0x1f7   : > { %758 = vrot.lane.b32.xlu0 %v639_v11, %s1407_s22  ;;  %v741_v26 = vsel %vm511_vm14, %v738_v18, %v740_v20 }
 0x1f8   : > { %764 = vrot.lane.b32.xlu1 %v660_v1, %s1407_s22 }
 0x1fa   : > { %v793_v22 = vpop.permute.xlu1 %792  ;;  %v795_v28 = vpop.permute.xlu0 %794 }
 0x1fb   : > { %750 = vrot.lane.b32.xlu0 %v1305_v21, %s1407_s22  ;;  %v818_v10 = vsel %vm802_vm4, %v793_v22, %v795_v28 }
 0x1fc   : > { %756 = vrot.lane.b32.xlu1 %v641_v30, %s1407_s22  ;;  %843 = vmatprep.subr.bf16.mxu1 %v818_v10 }
 0x1fe   : > { %v791_v33 = vpop.permute.xlu1 %790  ;;  %v775_v42 = vpop.permute.xlu0 %774 }
 0x1ff   : > { %748 = vrot.lane.b32.xlu0 %v1304_v24, %s1407_s22  ;;  %v817_v35 = vsel %vm802_vm4, %v791_v33, %v793_v22  ;;  %v1323_v22 = vcombine.low %v1724_v38, %v1724_v38 }
 0x200   : > { %754 = vrot.lane.b32.xlu1 %v640_v34, %s1407_s22  ;;  %844 = vmatpush1.bf16.msra.mxu1 %v817_v35 }
 0x202   : > { %v773_v43 = vpop.permute.xlu0 %772  ;;  %v777_v45 = vpop.permute.xlu1 %776 }
 0x203   : > { %800 = vrot.lane.b32.xlu0 %v740_v20, %s1407_s22  ;;  %v812_v57 = vsel %vm802_vm4, %v775_v42, %v777_v45  ;;  %v811_v59 = vsel %vm802_vm4, %v773_v43, %v775_v42 }
 0x204   : > { %752 = vrot.lane.b32.xlu1 %v1306_v40, %s1407_s22 }
 0x207   : > { %886 = vperm.xlu0 %1370, %v500_v12  }
 0x208   : > { %798 = vrot.lane.b32.xlu1 %v741_v26, %s1407_s22 }
 0x20c   : > { %796 = vrot.lane.b32.xlu1 %v738_v18, %s1407_s22 }
 0x210   : > { %893 = vperm.xlu1 %1371, %v501_v41  }
 0x251   : > { %v785_v44 = vpop.permute.xlu0 %784 }
 0x255   : > { %v783_v46 = vpop.permute.xlu0 %782 }
 0x256   : > { %v769_v47 = vpop.permute.xlu1 %768 }
 0x259   : > { %v787_v25 = vpop.permute.xlu0 %786 }
 0x25a   : > { %v789_v48 = vpop.permute.xlu1 %788  ;;  %v815_v29 = vsel %vm802_vm4, %v785_v44, %v787_v25 }
 0x25b   : > { %v816_v49 = vsel %vm802_vm4, %v787_v25, %v789_v48 }
 0x25c   : > { %845 = vmatprep.subr.bf16.mxu1 %v816_v49 }
 0x25d   : > { %846 = vmatpush1.bf16.msra.mxu1 %v815_v29  ;;  %v771_v50 = vpop.permute.xlu0 %770 }
 0x25e   : > { %v779_v52 = vpop.permute.xlu1 %778  ;;  %v810_v61 = vsel %vm802_vm4, %v769_v47, %v771_v50 }
 0x261   : > { %v763_v31 = vpop.permute.xlu0 %762 }
 0x262   : > { %v781_v53 = vpop.permute.xlu1 %780 }
 0x263   : > { %v814_v54 = vsel %vm802_vm4, %v781_v53, %v783_v46  ;;  %v813_v55 = vsel %vm802_vm4, %v779_v52, %v781_v53 }
 0x264   : > { %847 = vmatprep.subr.bf16.mxu1 %v814_v54 }
 0x265   : > { %848 = vmatpush1.bf16.msra.mxu1 %v813_v55  ;;  %v761_v56 = vpop.permute.xlu0 %760 }
 0x266   : > { %v767_v58 = vpop.permute.xlu1 %766  ;;  %849 = vmatprep.subr.bf16.mxu1 %v812_v57  ;;  %v807_v4 = vsel %vm802_vm4, %v761_v56, %v763_v31 }
 0x267   : > { %v809_v63 = vsel %vm802_vm4, %v767_v58, %v769_v47 }
 0x269   : > { %850 = vmatpush1.bf16.msra.mxu1 %v811_v59  ;;  %v759_v60 = vpop.permute.xlu0 %758 }
 0x26a   : > { %v765_v62 = vpop.permute.xlu1 %764  ;;  %851 = vmatprep.subr.bf16.mxu1 %v810_v61 }
 0x26b   : > { %v808_v1 = vsel %vm802_vm4, %v763_v31, %v765_v62 }
 0x26d   : > { %852 = vmatpush1.bf16.msra.mxu1 %v809_v63  ;;  %v751_v2 = vpop.permute.xlu0 %750 }
 0x26e   : > { %v757_v3 = vpop.permute.xlu1 %756  ;;  %853 = vmatprep.subr.bf16.mxu1 %v808_v1 }
 0x26f   : > { %v806_v5 = vsel %vm802_vm4, %v757_v3, %v759_v60 }
 0x271   : > { %854 = vmatpush1.bf16.msra.mxu1 %v807_v4  ;;  %v749_v11 = vpop.permute.xlu0 %748 }
 0x272   : > { %v755_v6 = vpop.permute.xlu1 %754  ;;  %855 = vmatprep.subr.bf16.mxu1 %v806_v5  ;;  %v803_v15 = vsel %vm802_vm4, %v749_v11, %v751_v2 }
 0x273   : > { %v805_v7 = vsel %vm802_vm4, %v755_v6, %v757_v3 }
 0x275   : > { %856 = vmatpush1.bf16.msra.mxu1 %v805_v7  ;;  %v801_v16 = vpop.permute.xlu0 %800 }
 0x276   : > { %v753_v13 = vpop.permute.xlu1 %752 }
 0x277   : > { %v804_v14 = vsel %vm802_vm4, %v751_v2, %v753_v13 }
 0x278   : > { %857 = vmatprep.subr.bf16.mxu1 %v804_v14 }
 0x279   : > { %858 = vmatpush1.bf16.msra.mxu1 %v803_v15 }
 0x27a   : > { %v799_v17 = vpop.permute.xlu1 %798 }
 0x27b   : > { %v820_v18 = vsel %vm802_vm4, %v799_v17, %v801_v16 }
 0x27c   : > { %873 = vmatprep.subr.bf16.mxu1 %v820_v18 }
 0x27e   : > { %v797_v20 = vpop.permute.xlu1 %796 }
 0x27f   : > { %v819_v21 = vsel %vm802_vm4, %v797_v20, %v799_v17 }
 0x280   : > { %874 = vmatpush2.bf16.msra.mxu1 %v819_v21 }
 0x282   : > { %v887_v28 = vpop.permute.xlu0 %886 }
 0x283   : > { %876 = vmatmul.mubr.bf16.vlgmr.msra.gmra.mxu1 %v1323_v22 }
 0x28b   : > { %v894_v10 = vpop.permute.xlu1 %893 }
 0x343   : > { %v877_v30 = vpop.f32.mrf.mxu1 }
 0x344   : > { %v889_v24 = vmul.f32 %v887_v28, %v877_v30 }
 0x345   : > { %v879_v33 = vpop.f32.mrf.mxu1 }
 0x346   : > { %v896_v34 = vadd.f32 %v894_v10, %v889_v24  ;;  %v890_v35 = vmul.f32 %v887_v28, %v879_v33 }
 0x347   : > { %v881_v36 = vpop.f32.mrf.mxu1 }
 0x348   : > { %v897_v37 = vadd.f32 %v894_v10, %v890_v35  ;;  %v898_v40 = vmax.f32 %v896_v34, 0.0 }
 0x349   : > { %v882_v39 = vpop.f32.mrf.mxu1 }
 0x34a   : > { %v899_v12 = vmax.f32 %v897_v37, 0.0 }
 0x34c   : > { %v1353_v26 = vpack.c.bf16 %v899_v12, %v898_v40 }
 0x34e   : > { %908 = vst [vmem:[#allocation3 + $0x4] sm:$0xff] %v1353_v26 }
 0x355   : > { %v1757_v41 = vld [vmem:[#allocation3 + $0x8] sm:$0xff]  ;;  %v1759_v42 = vld [vmem:[#allocation3] sm:$0xff] }
 0x356   : > { %944 = vrot.lane.b32.xlu0 %v1757_v41, %s1403_s18  ;;  %942 = vrot.lane.b32.xlu1 %v1759_v42, %s1403_s18  ;;  %v1332_v38 = vcombine.low %v1757_v41, %v1757_v41  ;;  %v1331_v43 = vcombine.high %v1759_v42, %v1759_v42  ;;  %v1343_v44 = vcombine.high %v1757_v41, %v1757_v41  ;;  %v916_v45 = vsel %vm530_vm12, %v1759_v42, 0 }
 0x357   : > { %v1334_v46 = vcombine.high %v916_v45, %v916_v45  ;;  %v917_v47 = vsel %vm1630_vm13, %v1757_v41, 0  ;;  %v918_v25 = vsel %vm541_vm10, %v1759_v42, 0  ;;  %v919_v49 = vsel %vm1601_vm11, %v1757_v41, 0 }
 0x358   : > { %v1335_v48 = vcombine.low %v917_v47, %v917_v47  ;;  %v1337_v8 = vcombine.high %v918_v25, %v918_v25  ;;  %v1338_v19 = vcombine.low %v919_v49, %v919_v49  ;;  %v1336_v23 = vcombine.low %v918_v25, %v918_v25 }
 0x359   : > { %v1333_v15 = vcombine.low %v916_v45, %v916_v45  ;;  %v1330_v27 = vcombine.low %v1759_v42, %v1759_v42 }
 0x35a   : > { %934 = vrot.lane.b32.xlu0 %v1757_v41, %s1401_s16  ;;  %932 = vrot.lane.b32.xlu1 %v1759_v42, %s1401_s16  ;;  %s1351_s16 = sshll.u32 %s1921_s10, 4 }
 0x35e   : > { %924 = vrot.lane.b32.xlu0 %v1757_v41, %s1402_s17  ;;  %922 = vrot.lane.b32.xlu1 %v1759_v42, %s1402_s17 }
 0x362   : > { %1035 = vrot.lane.b32.xlu0 %v1332_v38, %s1404_s19  ;;  %1033 = vrot.lane.b32.xlu1 %v1331_v43, %s1404_s19 }
 0x366   : > { %1006 = vrot.lane.b32.xlu0 %v1331_v43, %s1403_s18  ;;  %1037 = vrot.lane.b32.xlu1 %v1343_v44, %s1404_s19  ;;  %s349_s19 = scalar_lea.vmem %s1907_s9, %s1351_s16 }
 0x36a   : > { %1008 = vrot.lane.b32.xlu1 %v1332_v38, %s1403_s18  ;;  %984 = vrot.lane.b32.xlu0 %v1334_v46, %s1406_s21 }
 0x36e   : > { %986 = vrot.lane.b32.xlu1 %v1335_v48, %s1406_s21  ;;  %1000 = vrot.lane.b32.xlu0 %v1337_v8, %s1405_s20 }
 0x372   : > { %1002 = vrot.lane.b32.xlu1 %v1338_v19, %s1405_s20 }
 0x3c8   : > { %v945_v29 = vpop.permute.xlu0 %944  ;;  %v943_v51 = vpop.permute.xlu1 %942 }
 0x3c9   : > { %v947_v50 = vrot.slane %v945_v29, 4  ;;  %v946_v52 = vrot.slane %v943_v51, 4 }
 0x3cb   : > { %v948_v31 = vsel %vm563_vm7, %v946_v52, %v947_v50 }
 0x3cc   : > { %v935_v53 = vpop.permute.xlu0 %934  ;;  %v933_v54 = vpop.permute.xlu1 %932  ;;  %v949_v55 = vsel %vm511_vm14, %v948_v31, %v945_v29 }
 0x3cd   : > { %v937_v56 = vrot.slane %v935_v53, 4  ;;  %v936_v0 = vrot.slane %v933_v54, 4  ;;  %v951_v57 = vsel %vm1543_vm6, %v949_v55, 0 }
 0x3ce   : > { %v1344_v58 = vcombine.low %v951_v57, %v951_v57  ;;  %v1345_v59 = vcombine.high %v951_v57, %v951_v57 }
 0x3cf   : > { %v938_v60 = vsel %vm563_vm7, %v936_v0, %v937_v56  ;;  %v915_v56 = vsel %vm1706_vm5, %v1757_v41, 0  ;;  %v912_v41 = vld [vmem:[%s1905_s7] sm:$0xff] }
 0x3d0   : > { %v925_v61 = vpop.permute.xlu0 %924  ;;  %v923_v62 = vpop.permute.xlu1 %922  ;;  %1046 = vrot.lane.b32.xlu1 %v1344_v58, %s1403_s18  ;;  %1048 = vrot.lane.b32.xlu0 %v1345_v59, %s1403_s18  ;;  %v939_v63 = vsel %vm528_vm8, %v938_v60, %v935_v53  ;;  %v1329_v60 = vcombine.low %v915_v56, %v915_v56 }
 0x3d1   : > { %v927_v1 = vrot.slane %v925_v61, 4  ;;  %v926_v2 = vrot.slane %v923_v62, 4  ;;  %v941_v3 = vsel %vm1522_vm3, %v939_v63, 0  ;;  %vm1919_vm3 = vcmp.ne.s16.totalorder %v1688_v9, 0  ;;  %v913_v63 = vld [vmem:[%s1906_s8] sm:$0xff] }
 0x3d2   : > { %v1341_v4 = vcombine.low %v941_v3, %v941_v3  ;;  %v1342_v5 = vcombine.high %v941_v3, %v941_v3  ;;  %v914_v54 = vsel %vm1919_vm3, %v1759_v42, 0 }
 0x3d3   : > { %v928_v6 = vsel %vm563_vm7, %v926_v2, %v927_v1  ;;  %v1328_v59 = vcombine.high %v914_v54, %v914_v54  ;;  %v1327_v32 = vcombine.low %v914_v54, %v914_v54 }
 0x3d4   : > { %1026 = vrot.lane.b32.xlu1 %v1341_v4, %s1403_s18  ;;  %1028 = vrot.lane.b32.xlu0 %v1342_v5, %s1403_s18  ;;  %v929_v7 = vsel %vm539_vm9, %v928_v6, %v925_v61  ;;  %v1034_v16 = vpop.permute.xlu1 %1033  ;;  %v1036_v17 = vpop.permute.xlu0 %1035 }
 0x3d5   : > { %v931_v11 = vsel %vm1543_vm6, %v929_v7, 0  ;;  %v1039_v44 = vsel %vm726_vm15, %v1034_v16, %v1036_v17  ;;  %vm1148_vm6 = vcmask 588800  }
 0x3d6   : > { %v1340_v13 = vcombine.high %v931_v11, %v931_v11  ;;  %v1339_v14 = vcombine.low %v931_v11, %v931_v11 }
 0x3d8   : > { %1018 = vrot.lane.b32.xlu1 %v1340_v13, %s1403_s18  ;;  %1016 = vrot.lane.b32.xlu0 %v1339_v14, %s1403_s18  ;;  %v1038_v18 = vpop.permute.xlu1 %1037  ;;  %v1007_v20 = vpop.permute.xlu0 %1006 }
 0x3d9   : > { %v1040_v39 = vsel %vm726_vm15, %v1036_v17, %v1038_v18 }
 0x3dc   : > { %998 = vrot.lane.b32.xlu1 %v1336_v23, %s1405_s20  ;;  %982 = vrot.lane.b32.xlu0 %v1333_v15, %s1406_s21  ;;  %v1009_v21 = vpop.permute.xlu1 %1008  ;;  %v985_v22 = vpop.permute.xlu0 %984 }
 0x3dd   : > { %v1010_v49 = vsel %vm511_vm14, %v1007_v20, %v1009_v21 }
 0x3e0   : > { %970 = vrot.lane.b32.xlu1 %v1332_v38, %s1402_s17  ;;  %968 = vrot.lane.b32.xlu0 %v1331_v43, %s1402_s17  ;;  %v987_v28 = vpop.permute.xlu1 %986  ;;  %v1001_v30 = vpop.permute.xlu0 %1000 }
 0x3e1   : > { %v989_v19 = vsel %vm661_vm1, %v985_v22, %v987_v28 }
 0x3e4   : > { %966 = vrot.lane.b32.xlu0 %v1330_v27, %s1402_s17  ;;  %v1003_v10 = vpop.permute.xlu1 %1002 }
 0x3e5   : > { %v1005_v8 = vsel %vm683_vm0, %v1001_v30, %v1003_v10  ;;  %v1069_v55 = vsel %vm563_vm7, %v987_v28, %v1003_v10 }
 0x3e6   : > { %v1066_v50 = vsel %vm563_vm7, %v989_v19, %v1005_v8 }
 0x442   : > { %v1047_v24 = vpop.permute.xlu1 %1046  ;;  %v1049_v33 = vpop.permute.xlu0 %1048 }
 0x443   : > { %1124 = vrot.lane.b32.xlu1 %v1047_v24, %s1407_s22  ;;  %v1050_v34 = vsel %vm511_vm14, %v1047_v24, %v1049_v33 }
 0x444   : > { %1126 = vrot.lane.b32.xlu0 %v1050_v34, %s1407_s22 }
 0x446   : > { %v1027_v35 = vpop.permute.xlu1 %1026  ;;  %v1029_v36 = vpop.permute.xlu0 %1028 }
 0x447   : > { %1128 = vrot.lane.b32.xlu1 %v1049_v33, %s1407_s22  ;;  %v1081_v37 = vsel %vm563_vm7, %v1027_v35, %v1034_v16  ;;  %v1087_v26 = vsel %vm563_vm7, %v1029_v36, %v1040_v39  ;;  %v1030_v43 = vsel %vm511_vm14, %v1027_v35, %v1029_v36  ;;  %v911_v36 = vld [vmem:[%s1904_s6] sm:$0xf] }
 0x448   : > { %1118 = vrot.lane.b32.xlu0 %v1081_v37, %s1407_s22  ;;  %v1084_v48 = vsel %vm563_vm7, %v1030_v43, %v1039_v44 }
 0x44a   : > { %v1019_v40 = vpop.permute.xlu1 %1018  ;;  %v1017_v12 = vpop.permute.xlu0 %1016 }
 0x44b   : > { %1122 = vrot.lane.b32.xlu1 %v1087_v26, %s1407_s22  ;;  %v1078_v38 = vsel %vm563_vm7, %v1009_v21, %v1019_v40  ;;  %v1072_v47 = vsel %vm563_vm7, %v1007_v20, %v1017_v12  ;;  %v1020_v25 = vsel %vm511_vm14, %v1017_v12, %v1019_v40 }
 0x44c   : > { %1116 = vrot.lane.b32.xlu0 %v1078_v38, %s1407_s22  ;;  %v1075_v51 = vsel %vm563_vm7, %v1010_v49, %v1020_v25 }
 0x44e   : > { %v999_v45 = vpop.permute.xlu1 %998  ;;  %v983_v46 = vpop.permute.xlu0 %982 }
 0x44f   : > { %1112 = vrot.lane.b32.xlu1 %v1072_v47, %s1407_s22  ;;  %v1004_v52 = vsel %vm683_vm0, %v999_v45, %v1001_v30  ;;  %v988_v31 = vsel %vm661_vm1, %v983_v46, %v985_v22 }
 0x450   : > { %1120 = vrot.lane.b32.xlu0 %v1084_v48, %s1407_s22  ;;  %v1063_v57 = vsel %vm563_vm7, %v988_v31, %v1004_v52 }
 0x452   : > { %v969_v29 = vpop.permute.xlu0 %968  ;;  %v971_v53 = vpop.permute.xlu1 %970 }
 0x453   : > { %1114 = vrot.lane.b32.xlu1 %v1075_v51, %s1407_s22  ;;  %v973_v0 = vsel %vm539_vm9, %v969_v29, %v971_v53  ;;  %v1060_v42 = vsel %vm563_vm7, %v1329_v60, %v971_v53 }
 0x454   : > { %1108 = vrot.lane.b32.xlu0 %v1066_v50, %s1407_s22  ;;  %v1057_v9 = vsel %vm563_vm7, %v1328_v59, %v973_v0 }
 0x456   : > { %v967_v58 = vpop.permute.xlu0 %966 }
 0x457   : > { %1110 = vrot.lane.b32.xlu1 %v1069_v55, %s1407_s22  ;;  %v972_v61 = vsel %vm539_vm9, %v967_v58, %v969_v29 }
 0x458   : > { %1106 = vrot.lane.b32.xlu0 %v1063_v57, %s1407_s22  ;;  %v1054_v62 = vsel %vm563_vm7, %v1327_v32, %v972_v61 }
 0x45b   : > { %1102 = vrot.lane.b32.xlu1 %v1057_v9, %s1407_s22 }
 0x45c   : > { %1104 = vrot.lane.b32.xlu0 %v1060_v42, %s1407_s22 }
 0x45f   : > { %1100 = vrot.lane.b32.xlu1 %v1054_v62, %s1407_s22 }
 0x460   : > { %1201 = vperm.xlu0 %1370, %v912_v41  }
 0x463   : > { %1208 = vperm.xlu1 %1371, %v913_v63  }
 0x4b5   : > { %v1125_v1 = vpop.permute.xlu1 %1124 }
 0x4b6   : > { %v1127_v2 = vpop.permute.xlu0 %1126 }
 0x4b7   : > { %v1138_v3 = vsel %vm802_vm4, %v1125_v1, %v1127_v2 }
 0x4b8   : > { %v1153_v7 = vsel %vm563_vm7, %v1138_v3, 0 }
 0x4b9   : > { %v1129_v4 = vpop.permute.xlu1 %1128 }
 0x4ba   : > { %v1139_v5 = vsel %vm802_vm4, %v1127_v2, %v1129_v4  ;;  %v1119_v6 = vpop.permute.xlu0 %1118 }
 0x4bb   : > { %1346 = vmatprep.subr.msk.bf16.mxu0 %vm563_vm7, %v1139_v5 }
 0x4bc   : > { %1165 = vmatpush1.bf16.msra.mxu0 %v1153_v7 }
 0x4bd   : > { %v1123_v11 = vpop.permute.xlu1 %1122 }
 0x4be   : > { %v1117_v13 = vpop.permute.xlu0 %1116 }
 0x4c1   : > { %v1113_v14 = vpop.permute.xlu1 %1112 }
 0x4c2   : > { %v1121_v23 = vpop.permute.xlu0 %1120 }
 0x4c3   : > { %v1136_v15 = vsel %vm802_vm4, %v1119_v6, %v1121_v23  ;;  %v1137_v27 = vsel %vm802_vm4, %v1121_v23, %v1123_v11 }
 0x4c4   : > { %1166 = vmatprep.subr.bf16.mxu0 %v1137_v27 }
 0x4c5   : > { %v1115_v16 = vpop.permute.xlu1 %1114  ;;  %1167 = vmatpush1.bf16.msra.mxu0 %v1136_v15 }
 0x4c6   : > { %v1109_v17 = vpop.permute.xlu0 %1108  ;;  %v1135_v18 = vsel %vm802_vm4, %v1115_v16, %v1117_v13  ;;  %v1134_v20 = vsel %vm802_vm4, %v1113_v14, %v1115_v16 }
 0x4c7   : > { %1168 = vmatprep.subr.bf16.mxu0 %v1135_v18 }
 0x4c9   : > { %v1111_v21 = vpop.permute.xlu1 %1110  ;;  %1169 = vmatpush1.bf16.msra.mxu0 %v1134_v20 }
 0x4ca   : > { %v1107_v22 = vpop.permute.xlu0 %1106  ;;  %v1133_v28 = vsel %vm802_vm4, %v1109_v17, %v1111_v21 }
 0x4cb   : > { %v1132_v30 = vsel %vm802_vm4, %v1107_v22, %v1109_v17  ;;  %1170 = vmatprep.subr.bf16.mxu0 %v1133_v28 }
 0x4cd   : > { %1171 = vmatpush1.bf16.msra.mxu0 %v1132_v30  ;;  %v1103_v10 = vpop.permute.xlu1 %1102 }
 0x4ce   : > { %v1105_v24 = vpop.permute.xlu0 %1104 }
 0x4cf   : > { %v1131_v33 = vsel %vm802_vm4, %v1103_v10, %v1105_v24 }
 0x4d0   : > { %1172 = vmatprep.subr.bf16.mxu0 %v1131_v33 }
 0x4d1   : > { %v1101_v34 = vpop.permute.xlu1 %1100 }
 0x4d2   : > { %v1130_v35 = vsel %vm802_vm4, %v1101_v34, %v1103_v10 }
 0x4d3   : > { %1173 = vmatpush1.bf16.msra.mxu0 %v1130_v35 }
 0x4d6   : > { %1347 = vmatmul.mubr.msk.bf16.vlgmr.msra.gmra.mxu0 %vm1148_vm6, %v911_v36 }
 0x4db   : > { %v1202_v37 = vpop.permute.xlu0 %1201 }
 0x4de   : > { %v1209_v12 = vpop.permute.xlu1 %1208 }
 0x596   : > { %v1192_v39 = vpop.f32.mrf.mxu0 }
 0x597   : > { %v1204_v40 = vmul.f32 %v1202_v37, %v1192_v39 }
 0x598   : > { %v1194_v26 = vpop.f32.mrf.mxu0 }
 0x599   : > { %v1211_v38 = vadd.f32 %v1209_v12, %v1204_v40  ;;  %v1205_v43 = vmul.f32 %v1202_v37, %v1194_v26 }
 0x59a   : > { %v1196_v44 = vpop.f32.mrf.mxu0 }
 0x59b   : > { %v1213_v45 = vmax.f32 %v1211_v38, 0.0  ;;  %v1212_v46 = vadd.f32 %v1209_v12, %v1205_v43 }
 0x59c   : > { %v1197_v47 = vpop.f32.mrf.mxu0 }
 0x59d   : > { %1215 = vst [vmem:[%s349_s19] sm:$0xff] %v1213_v45  ;;  %v1214_v25 = vmax.f32 %v1212_v46, 0.0 }
 0x59f   : > { %1216 = vst [vmem:[%s349_s19 + $0x8] sm:$0xff] %v1214_v25 }
 0x5a0 PF: > { %s19_s30 = sadd.s32 1, %s1398_s30  }
 0x5a1   : > { %p16_p4 = scmp.ge.s32.totalorder %s19_s30, 4  }
 0x5a3   :  { %18 = sbr.rel (!%p16_p4) target bundleno = 1 (0x1), region = 89 }

</bundles_post_ra>
